<compile_context>
chip_gen: v6e
topology: v6e:2x2x1
jax: 0.10.0
libtpu: 0.0.40
codegen_flags: <defaults>
</compile_context>

<pallas_src>
import functools

import jax
import jax.numpy as jnp
from jax.experimental import pallas as pl
from jax.experimental.pallas import tpu as pltpu


def _round_up(x, m):
    return (x + m - 1) // m * m


def _cdiv(a, b):
    return (a + b - 1) // b


# ----------------------------------------------------------------------------
# pltpu.roll direction probe (runs once at import).  We always need a *left*
# rotation: y[:, c] = x[:, c + off]; shifts are expressed for the probed
# semantics so compiled kernels are always correct.
# ----------------------------------------------------------------------------
def _probe_roll_kernel(x_ref, o_ref):
    o_ref[...] = pltpu.roll(x_ref[...], 1, axis=1)


def _probe_roll_direction():
    x = jnp.arange(8 * 128, dtype=jnp.float32).reshape(8, 128)
    y = pl.pallas_call(
        _probe_roll_kernel,
        out_shape=jax.ShapeDtypeStruct((8, 128), jnp.float32),
    )(x)
    return bool(jnp.allclose(y, jnp.roll(x, 1, axis=1)))


_ROLL_NUMPY_SEMANTICS = _probe_roll_direction()


# ----------------------------------------------------------------------------
# Pallas kernel 1: fused multi-tap stride-1 conv, tiled over the lane axis.
#   Per tile: xcat = [main tile | right halo] (Cin, tile_l+halo) bf16,
#   build xk = concat_t(left_shift(xcat, off_t)[:, :tile_l]) -> (T*Cin, tile_l),
#   acc = W(Cout, T*Cin) @ xk  (MXU, f32 acc), + bias (+ReLU),
#   optional fused 1x1: acc = W2 @ acc + b2.  Output block is lane-dense.
# ----------------------------------------------------------------------------
def _conv_tile_kernel(*refs, shifts, relu, tile_l, has_post):
    if has_post:
        xm_ref, xh_ref, w_ref, b_ref, w2_ref, b2_ref, o_ref = refs
    else:
        xm_ref, xh_ref, w_ref, b_ref, o_ref = refs

    # (Cin, tile_l + halo) bf16: main tile + right halo (next columns of the slab)
    xcat = jnp.concatenate([xm_ref[...], xh_ref[...]], axis=1)

    parts = []
    for s in shifts:
        xs = xcat if s == 0 else pltpu.roll(xcat, s, axis=1)
        parts.append(xs[:, :tile_l])
    xk = jnp.concatenate(parts, axis=0)            # (T*Cin, tile_l) bf16

    # single K = T*Cin matmul on the MXU, f32 accumulation
    acc = jnp.dot(w_ref[...], xk, preferred_element_type=jnp.float32)
    acc = acc + b_ref[...]                         # (Cout, 1) broadcast
    if relu:
        acc = jnp.maximum(acc, 0.0)

    if has_post:                                   # fused 1x1 conv (no activation)
        acc = jnp.dot(w2_ref[...], acc.astype(jnp.bfloat16),
                      preferred_element_type=jnp.float32) + b2_ref[...]

    o_ref[...] = acc.astype(o_ref.dtype)


def fused_conv(x2, w_taps, bias, offsets, *, relu, post=None,
               out_dtype=jnp.bfloat16, tile_l_max=512):
    """x2: (Cin, L) slab, channels on sublanes, flattened (n, h, w) on lanes.
    w_taps: (T, Cout, Cin) per-tap weights (tap order == offsets order).
    bias: (Cout,).  offsets: python-int lane offsets of each tap (>= 0).
    post: optional (W2 (Cout2, Cout), b2 (Cout2,)) 1x1 conv fused after the ReLU.
    Returns (Cout_final, Lp) out_dtype, Lp = num_tiles * tile_l >= L; caller
    slices [:, :L].  Outputs are lane-dense (tile_l is a multiple of 128)."""
    cin, L = x2.shape
    T, cout, cin2 = w_taps.shape
    assert cin2 == cin and T == len(offsets)

    max_off = max(offsets)
    halo = max(128, _round_up(max_off, 128))         # 128-aligned right halo
    tile_l = min(tile_l_max, _round_up(L, 128))
    tile_l = max(halo, _round_up(tile_l, halo))      # tile must be a halo multiple
    assert max_off <= halo <= tile_l
    num_tiles = _cdiv(L, tile_l)
    lp = num_tiles * tile_l
    width = tile_l + halo

    # bf16 slab, zero-padded so every tile (incl. the last) has a full right halo.
    xpad = jnp.pad(x2.astype(jnp.bfloat16), ((0, 0), (0, lp + halo - L)))

    # Express "left rotate by off" for the probed pltpu.roll direction.
    if _ROLL_NUMPY_SEMANTICS:
        shifts = tuple((width - (o % width)) % width for o in offsets)
    else:
        shifts = tuple(o % width for o in offsets)

    # Concatenate taps along the contraction axis -> one K = T*Cin matmul.
    w_cat = jnp.concatenate([w_taps[t] for t in range(T)],
                            axis=1).astype(jnp.bfloat16)          # (Cout, T*Cin)
    b_col = bias.reshape(cout, 1).astype(jnp.float32)

    blocks_per_tile = tile_l // halo
    operands = [xpad, xpad, w_cat, b_col]
    in_specs = [
        pl.BlockSpec((cin, tile_l), lambda i: (0, i)),                        # main tile
        pl.BlockSpec((cin, halo), lambda i: (0, (i + 1) * blocks_per_tile)),  # right halo
        pl.BlockSpec((cout, T * cin), lambda i: (0, 0)),                      # resident W
        pl.BlockSpec((cout, 1), lambda i: (0, 0)),                            # resident b
    ]
    cout_fin = cout
    has_post = post is not None
    if has_post:
        w2, b2 = post
        cout_fin = w2.shape[0]
        assert w2.shape == (cout_fin, cout)
        operands += [w2.astype(jnp.bfloat16),
                     b2.reshape(cout_fin, 1).astype(jnp.float32)]
        in_specs += [pl.BlockSpec((cout_fin, cout), lambda i: (0, 0)),
                     pl.BlockSpec((cout_fin, 1), lambda i: (0, 0))]

    out = pl.pallas_call(
        functools.partial(_conv_tile_kernel, shifts=shifts, relu=relu,
                          tile_l=tile_l, has_post=has_post),
        out_shape=jax.ShapeDtypeStruct((cout_fin, lp), out_dtype),
        grid=(num_tiles,),
        in_specs=in_specs,
        out_specs=pl.BlockSpec((cout_fin, tile_l), lambda i: (0, i)),
        compiler_params=pltpu.CompilerParams(
            dimension_semantics=("parallel",),
            vmem_limit_bytes=48 * 1024 * 1024),
    )(*operands)
    return out


# ----------------------------------------------------------------------------
# Conv layer wrappers (channels-first activations: (C, N, H, W))
# ----------------------------------------------------------------------------
def enc_conv_s2(a, wb, *, relu, post=None, out_dtype=jnp.bfloat16):
    """PyTorch Conv2d(k=4, stride=2, pad=1) via space-to-depth + 2x2 fused conv.
    `post` (optional): raw 1x1 Conv2d params fused after the ReLU."""
    w, b = wb                                          # w: (Cout, Cin, 4, 4)
    cout, cin = w.shape[0], w.shape[1]
    c, n, h, wd = a.shape
    assert c == cin and h % 2 == 0 and wd % 2 == 0
    ho, wo = h // 2, wd // 2
    hs, ws = ho + 1, wo + 1
    ap = jnp.pad(a, ((0, 0), (0, 0), (1, 1), (1, 1)))  # (Cin, N, 2*hs, 2*ws)
    # space-to-depth: channel order (di, dj, ci)
    xs = ap.reshape(cin, n, hs, 2, ws, 2).transpose(3, 5, 0, 1, 2, 4)
    xs = xs.reshape(4 * cin, n * hs * ws)
    offsets = [ti * ws + tj for ti in range(2) for tj in range(2)]
    assert max(offsets) < hs * ws                      # taps stay within one image slab
    # W[co, ci, 2ti+di, 2tj+dj] -> Wg[(ti,tj), co, (di,dj,ci)]
    wg = w.reshape(cout, cin, 2, 2, 2, 2).transpose(2, 4, 0, 3, 5, 1)
    wg = wg.reshape(4, cout, 4 * cin)
    if post is not None:
        w2, b2 = post                                  # (Cout2, Cout, 1, 1)
        post = (w2.reshape(w2.shape[0], w2.shape[1]), b2)
        assert post[0].shape[1] == cout
    out = fused_conv(xs, wg, b, offsets, relu=relu, post=post, out_dtype=out_dtype)
    co_fin = out.shape[0]
    out = out[:, :n * hs * ws].reshape(co_fin, n, hs, ws)[:, :, :ho, :wo]
    return out


def deconv_s2(a, wb, *, relu, post=None, out_dtype=jnp.bfloat16):
    """PyTorch ConvTranspose2d(k=4, stride=2, pad=1) via phase-packed 3x3 conv on
    the undilated input + depth-to-space.  `post` (optional): raw 1x1 Conv2d
    params fused after the ReLU as a per-phase (block-diagonal) matmul."""
    wt, b = wb                                         # wt: (Cin, Cout, 4, 4)
    cin, cout = wt.shape[0], wt.shape[1]
    c, n, h, wd = a.shape
    assert c == cin
    hp, wp = h + 2, wd + 2
    ap = jnp.pad(a, ((0, 0), (0, 0), (1, 1), (1, 1))).reshape(cin, n * hp * wp)
    offsets = [uy * wp + ux for uy in range(3) for ux in range(3)]
    assert max(offsets) < hp * wp                      # taps stay within one image slab
    # Union 3x3 weight: Wu[(uy,ux), (r,s,co), ci] = Wt[ci, co, r+3-2uy, s+3-2ux]
    # when that kernel index is valid for phase (r,s), else structural zero.
    zero = jnp.zeros((cout, cin), wt.dtype)
    taps = []
    for uy in range(3):
        for ux in range(3):
            rows = []
            for r in range(2):
                for s in range(2):
                    ky, kx = r + 3 - 2 * uy, s + 3 - 2 * ux
                    if 0 <= ky < 4 and 0 <= kx < 4:
                        rows.append(wt[:, :, ky, kx].T)    # (Cout, Cin)
                    else:
                        rows.append(zero)
            taps.append(jnp.concatenate(rows, axis=0))     # (4*Cout, Cin)
    wu = jnp.stack(taps, axis=0)                           # (9, 4*Cout, Cin)
    bias4 = jnp.tile(b, 4)
    if post is not None:
        w2, b2 = post                                      # (Cout2, Cout, 1, 1)
        co2 = w2.shape[0]
        w2m = w2.reshape(co2, w2.shape[1])
        assert w2m.shape[1] == cout
        # per-phase 1x1 on the phase-packed channels: block-diagonal weight
        post = (jnp.kron(jnp.eye(4, dtype=w2m.dtype), w2m), jnp.tile(b2, 4))
    out = fused_conv(ap, wu, bias4, offsets, relu=relu, post=post,
                     out_dtype=out_dtype)
    co_pack = out.shape[0]
    co_fin = co_pack // 4
    out = out[:, :n * hp * wp].reshape(co_pack, n, hp, wp)[:, :, :h, :wd]
    # depth-to-space: channel (r, s, co) -> spatial (2h+r, 2w+s)
    out = out.reshape(2, 2, co_fin, n, h, wd).transpose(2, 3, 4, 0, 5, 1)
    return out.reshape(co_fin, n, 2 * h, 2 * wd)


# ----------------------------------------------------------------------------
# Pallas kernel 2: vector quantization, channels-first, tiled over columns.
#   scores[k, m] = ||e_k||^2 - 2 <e_k, x_m>  (||x||^2 constant per column).
#   Codebook, its transpose and squared norms stay resident; outputs are
#   lane-dense (D, tm), (1, tm), (1, tm); the tile axis is "parallel".
# ----------------------------------------------------------------------------
def _vq_kernel(x_ref, e_ref, et_ref, esq_ref, quant_ref, ids_ref, err_ref):
    x = x_ref[...]                                                  # (D, tm)  f32
    e = e_ref[...]                                                  # (Kc, D)  f32
    kc = e.shape[0]
    xe = jnp.dot(e, x, preferred_element_type=jnp.float32)          # (Kc, tm)
    scores = esq_ref[...] - 2.0 * xe                                # (Kc, tm)
    min_s = jnp.min(scores, axis=0, keepdims=True)                  # (1, tm)
    row = jax.lax.broadcasted_iota(jnp.int32, scores.shape, 0)      # (Kc, tm)
    idx = jnp.min(jnp.where(scores <= min_s, row, kc),
                  axis=0, keepdims=True)                            # first-occurrence argmin
    onehot = (row == idx).astype(jnp.float32)                       # (Kc, tm)
    quant = jnp.dot(et_ref[...], onehot, preferred_element_type=jnp.float32)  # (D, tm)
    diff = quant - x
    quant_ref[...] = quant
    ids_ref[...] = idx
    err_ref[...] = jnp.sum(diff * diff, axis=0, keepdims=True)      # per-column SSE


def pallas_vq(x_cf, codebook, *, tm_max=2048):
    """x_cf: (D, M) channels-first; codebook: (Kc, D).
    Returns quant (D, M) f32, ids (M,) int32, sse scalar f32."""
    d, m = x_cf.shape
    kc, d2 = codebook.shape
    assert d == d2
    tm = min(tm_max, _round_up(m, 128))
    m_pad = _round_up(m, tm)
    num_tiles = m_pad // tm

    x_f = x_cf.astype(jnp.float32)
    if m_pad != m:
        # pad columns with codebook[0]: they quantize to themselves -> zero error
        pad_cols = jnp.broadcast_to(
            codebook[0].astype(jnp.float32)[:, None], (d, m_pad - m))
        x_f = jnp.concatenate([x_f, pad_cols], axis=1)

    e = codebook.astype(jnp.float32)                                # (Kc, D)
    et = e.T                                                        # (D, Kc) hoisted
    esq = jnp.sum(e * e, axis=-1, keepdims=True)                    # (Kc, 1) hoisted

    quant, ids, sqerr = pl.pallas_call(
        _vq_kernel,
        out_shape=(
            jax.ShapeDtypeStruct((d, m_pad), jnp.float32),
            jax.ShapeDtypeStruct((1, m_pad), jnp.int32),
            jax.ShapeDtypeStruct((1, m_pad), jnp.float32),
        ),
        grid=(num_tiles,),
        in_specs=[
            pl.BlockSpec((d, tm), lambda i: (0, i)),
            pl.BlockSpec((kc, d), lambda i: (0, 0)),
            pl.BlockSpec((d, kc), lambda i: (0, 0)),
            pl.BlockSpec((kc, 1), lambda i: (0, 0)),
        ],
        out_specs=(
            pl.BlockSpec((d, tm), lambda i: (0, i)),
            pl.BlockSpec((1, tm), lambda i: (0, i)),
            pl.BlockSpec((1, tm), lambda i: (0, i)),
        ),
        compiler_params=pltpu.CompilerParams(
            dimension_semantics=("parallel",),
            vmem_limit_bytes=48 * 1024 * 1024),
    )(x_f, e, et, esq)
    sse = jnp.sum(sqerr[:, :m])          # padded columns contribute exactly zero
    return quant[:, :m], ids[0, :m], sse


# ----------------------------------------------------------------------------
# Parameters (deterministic synthetic init, PyTorch-default-like uniform)
# ----------------------------------------------------------------------------
def _init_conv(key, cout, cin, kh, kw):
    k1, k2 = jax.random.split(key)
    bound = 1.0 / jnp.sqrt(cin * kh * kw)
    w = jax.random.uniform(k1, (cout, cin, kh, kw), jnp.float32, -bound, bound)
    b = jax.random.uniform(k2, (cout,), jnp.float32, -bound, bound)
    return w, b


def _init_convT(key, cin, cout, kh, kw):
    k1, k2 = jax.random.split(key)
    bound = 1.0 / jnp.sqrt(cin * kh * kw)
    w = jax.random.uniform(k1, (cin, cout, kh, kw), jnp.float32, -bound, bound)
    b = jax.random.uniform(k2, (cout,), jnp.float32, -bound, bound)
    return w, b


def init_vqvae_params(key, *, in_channel, channel, embed_dim, n_embed):
    keys = jax.random.split(key, 9)
    p = {}
    # Encoder
    p["e1"] = _init_conv(keys[0], channel, in_channel, 4, 4)
    p["e2"] = _init_conv(keys[1], channel, channel, 4, 4)
    p["e3"] = _init_conv(keys[2], channel, channel, 4, 4)
    p["e4"] = _init_conv(keys[3], embed_dim, channel, 1, 1)
    # Decoder
    p["d1"] = _init_convT(keys[4], embed_dim, channel, 4, 4)
    p["d2"] = _init_convT(keys[5], channel, channel, 4, 4)
    p["d3"] = _init_convT(keys[6], channel, channel, 4, 4)
    p["d4"] = _init_conv(keys[7], in_channel, channel, 1, 1)
    # Codebook (VectorQuantizeEMA embedding)
    p["codebook"] = jax.random.normal(keys[8], (n_embed, embed_dim), jnp.float32)
    return p


# ----------------------------------------------------------------------------
# VQVAE forward (quantizer == 'ema'/'origin' path)
# ----------------------------------------------------------------------------
def vqvae_forward(params, x):
    """x: (N, in_channel, H, W) NCHW -> (dec, diff, id_t) like VQVAE.forward(return_id=True)."""
    a = jnp.transpose(x, (1, 0, 2, 3)).astype(jnp.bfloat16)   # channels-first, bf16 datapath

    # ---------------- Encoder (e4 1x1 projection fused into e3's kernel) ----------------
    a = enc_conv_s2(a, params["e1"], relu=True)
    a = enc_conv_s2(a, params["e2"], relu=True)
    logits = enc_conv_s2(a, params["e3"], relu=True, post=params["e4"],
                         out_dtype=jnp.float32)               # (D, N, Hq, Wq) f32

    # ---------------- Quantize (EMA forward semantics, exact f32 distances) ----------------
    dm, nb, hq, wq = logits.shape
    m = nb * hq * wq
    quant_flat, ids, sse = pallas_vq(logits.reshape(dm, m), params["codebook"])
    diff_t = (sse / (m * dm))[None]                           # diff.unsqueeze(0) -> (1,)
    id_t = ids.reshape(nb, hq, wq)
    quant = quant_flat.reshape(dm, nb, hq, wq).astype(jnp.bfloat16)  # fwd value of STE

    # ---------------- Decoder (d4 1x1 fused into d3's kernel) ----------------
    d = deconv_s2(quant, params["d1"], relu=True)
    d = deconv_s2(d, params["d2"], relu=True)
    dec_cf = deconv_s2(d, params["d3"], relu=True, post=params["d4"],
                       out_dtype=jnp.float32)                 # (in_channel, N, H, W)
    dec = jnp.transpose(dec_cf, (1, 0, 2, 3))

    return dec, diff_t, id_t
    # TODO(synk): LFQ / FSQ quantizer branches were not provided in the source
    # module; only the 'ema'/'origin' VectorQuantize forward path is implemented.


# ----------------------------------------------------------------------------
# Demo
# ----------------------------------------------------------------------------
if __name__ == "__main__":
    in_channel, channel, embed_dim, n_embed = 4, 32, 16, 128
    batch, spatial = 2, 32

    key = jax.random.PRNGKey(0)
    kx, kp = jax.random.split(key)
    x = jax.random.normal(kx, (batch, in_channel, spatial, spatial), jnp.float32)
    params = init_vqvae_params(
        kp, in_channel=in_channel, channel=channel,
        embed_dim=embed_dim, n_embed=n_embed)

    dec, diff, id_t = jax.jit(vqvae_forward)(params, x)
    jax.block_until_ready((dec, diff, id_t))

    assert dec.shape == (batch, in_channel, spatial, spatial), dec.shape
    assert diff.shape == (1,), diff.shape
    assert id_t.shape == (batch, spatial // 8, spatial // 8), id_t.shape
    print("KERNEL_OK")
</pallas_src>

<mosaic_0001>
module attributes {stable_mosaic.version = 11 : i64} {
  func.func @_probe_roll_kernel(%arg0: memref<8x128xf32, #tpu.memory_space<vmem>>, %arg1: memref<8x128xf32, #tpu.memory_space<vmem>>) attributes {dimension_semantics = [], scalar_prefetch = 0 : i64, scratch_operands = 0 : i64, tpu.core_type = #tpu.core_type<tc>} {
    %c0 = arith.constant 0 : index
    %c0_0 = arith.constant 0 : index
    %0 = vector.load %arg0[%c0, %c0_0] : memref<8x128xf32, #tpu.memory_space<vmem>>, vector<8x128xf32>
    %c1_i32 = arith.constant 1 : i32
    %1 = tpu.dynamic_rotate %0 by %c1_i32 dim 1 : vector<8x128xf32>, i32 -> vector<8x128xf32>
    %c0_1 = arith.constant 0 : index
    %c0_2 = arith.constant 0 : index
    %2 = vector.load %arg1[%c0_1, %c0_2] : memref<8x128xf32, #tpu.memory_space<vmem>>, vector<8x128xf32>
    tpu.vector_store %arg1[%c0_1, %c0_2], %1 {strides = array<i32>} : memref<8x128xf32, #tpu.memory_space<vmem>>, vector<8x128xf32>,
    return
  }
}

</mosaic_0001>

<bundles_post_ra>
// kernel: tpu_custom_call.1
= control target key start
LH: loop header
LB: loop body
LE: loop exit
PB: predicated region body
PF: predicated region fallthrough
CT: control target
= control target key end

     0   :  { %6 = vsyncpa [#allocation3], 0  ;;  %s106_s0 = inlined_call_operand.hbm [shape: f32[8,128], index: 0, kind: input, shape index: {}]   ;;  %s107_s1 = inlined_call_operand.hbm [shape: f32[8,128], index: 1, kind: output, shape index: {}]  }
   0x1   :  { %7 = vsyncpa [#allocation4], 0  ;;  %s87_s6 = smov [#allocation2]  }
   0x2   :  { %s14_s7 = sshll.u32 %s87_s6, 4  ;;  %s15_s7 = int_to_ptr.vmem [resolvable:$true] %s14_s7 }
   0x3   :  { %s51_s8 = scalar_lea.vmem %s15_s7, 128  ;;  %p56_p1 = scmp.lt.s32.totalorder %s15_s7, %s15_s7 }
   0x4   :  { %p52_p0 = scmp.ne.s32.totalorder %s15_s7, %s51_s8  ;;  %p57_p2 = scmp.lt.s32.totalorder %s51_s8, %s51_s8 }
   0x6   :  { %p58_p3 = por %p57_p2, %p56_p1 }
   0x8   :  { %p59_p4 = pnand %p58_p3, %p52_p0 }
   0xa   :  { %62 = shalt.err (!%p59_p4)
}
   0xb   :  { %17 = dma.hbm_to_vmem [thread:$0]  %s106_s0, 128, %s15_s7, [#allocation3]  }
   0xc   :  { %83 = dma.done.wait [#allocation3], 128  }
   0xd   :  { %84 = vsyncadd [#allocation3], 4294967168  ;;  %v21_v0 = vld [vmem:[#allocation2] sm:$0xff]  ;;  %s88_s11 = smov 1   ;;  %s89_s12 = smov [#allocation5]  }
   0xe   :  { %22 = vrot.lane.b32.xlu0 %v21_v0, %s88_s11  ;;  %s31_s13 = sshll.u32 %s89_s12, 4  ;;  %s32_s13 = int_to_ptr.vmem [resolvable:$true] %s31_s13 }
   0xf   :  { %s63_s14 = scalar_lea.vmem %s32_s13, 128  ;;  %p68_p6 = scmp.lt.s32.totalorder %s32_s13, %s32_s13 }
  0x10   :  { %p64_p5 = scmp.ne.s32.totalorder %s32_s13, %s63_s14  ;;  %p69_p7 = scmp.lt.s32.totalorder %s63_s14, %s63_s14 }
  0x12   :  { %p70_p8 = por %p69_p7, %p68_p6 }
  0x14   :  { %p71_p9 = pnand %p70_p8, %p64_p5 }
  0x80   :  { %v23_v1 = vpop.permute.xlu0 %22 }
  0x81   :  { %24 = vst [vmem:[#allocation5] sm:$0xff] %v23_v1 }
  0x82   :  { %74 = shalt.err (!%p71_p9)
}
  0x83   :  { %34 = dma.vmem_to_hbm [thread:$0]  %s32_s13, 128, %s107_s1, [#allocation4]  }
  0x84   :  { %85 = dma.done.wait [#allocation4], 128  }
  0x85   :  { %86 = vsyncadd [#allocation4], 4294967168 }
  0x86   :  { %38 = vsyncpa [#allocation3], 1 }
  0x87   :  { %39 = vsyncpa [#allocation4], 1 }

</bundles_post_ra>
